<compile_context>
chip_gen: v6e
topology: v6e:2x2x1
jax: 0.10.0
libtpu: 0.0.40
codegen_flags: <defaults>
</compile_context>

<pallas_src>
import functools
import math

import numpy as np
import jax
import jax.numpy as jnp
from jax import lax
from jax.experimental import pallas as pl
from jax.experimental.pallas import tpu as pltpu

EPS = 1e-5          # BatchNorm eps (PyTorch default); training-mode (batch-stat) normalization.
LANE = 128          # TPU lane width; all channel dims padded to multiples of this.


def _pad_to(n, m=LANE):
    return ((n + m - 1) // m) * m


@functools.lru_cache(maxsize=None)
def _device_kind():
    try:
        return jax.devices()[0].device_kind.lower()
    except Exception:
        return ""


def _vmem_limit_bytes():
    kind = _device_kind()
    if ("v5" in kind) or ("v6" in kind):
        return 96 * 1024 * 1024        # 128 MiB physical VMEM -> generous scoped limit
    return 32 * 1024 * 1024            # v7x (64 MiB physical) / unknown: conservative


def _default_tile_m():
    kind = _device_kind()
    if ("v5" in kind) or ("v6" in kind):
        return 2048
    return 1024


def _cparams(sem):
    return pltpu.CompilerParams(dimension_semantics=sem,
                                vmem_limit_bytes=_vmem_limit_bytes())


# ---------------------------------------------------------------------------
# Pass 1: conv1 (1x1) as tiled bf16 matmul + per-tile BN partial sums
# ---------------------------------------------------------------------------
def _conv1_kernel(x_ref, w_ref, y_ref, ssum_ref, ssq_ref):
    acc = jnp.dot(x_ref[...], w_ref[...], preferred_element_type=jnp.float32)
    y_ref[...] = acc.astype(y_ref.dtype)
    ssum_ref[0] = jnp.sum(acc, axis=0, keepdims=True)
    ssq_ref[0] = jnp.sum(acc * acc, axis=0, keepdims=True)


def conv1_matmul(x2d, w1p, tile_m):
    M, cin_p = x2d.shape
    wp = w1p.shape[1]
    nt = M // tile_m
    return pl.pallas_call(
        _conv1_kernel,
        grid=(nt,),
        in_specs=[pl.BlockSpec((tile_m, cin_p), lambda i: (i, 0)),
                  pl.BlockSpec((cin_p, wp), lambda i: (0, 0))],
        out_specs=[pl.BlockSpec((tile_m, wp), lambda i: (i, 0)),
                   pl.BlockSpec((1, 1, wp), lambda i: (i, 0, 0)),
                   pl.BlockSpec((1, 1, wp), lambda i: (i, 0, 0))],
        out_shape=[jax.ShapeDtypeStruct((M, wp), jnp.bfloat16),
                   jax.ShapeDtypeStruct((nt, 1, wp), jnp.float32),
                   jax.ShapeDtypeStruct((nt, 1, wp), jnp.float32)],
        compiler_params=_cparams(("parallel",)),
    )(x2d, w1p)


# ---------------------------------------------------------------------------
# Pass 2: fused [bn1 + ReLU] -> grouped 3x3 conv.
#   * bn1/relu result is written into the interior of a padded VMEM scratch whose 4 halo strips are
#     zeroed per step (conv "padding=1" semantics) — no XLA jnp.pad and no full-tile select.
#   * fused im2col: the 9 shifted windows are concatenated along the contraction dim and contracted
#     in a single (HW, 9*128) @ (9*128, 128) MXU dot.
#   Grid: (channel_blocks, batch) — groups never cross a 128-channel block.
# ---------------------------------------------------------------------------
def _conv2_kernel(y1_ref, w2_ref, s1_ref, b1_ref, y2_ref, ssum_ref, ssq_ref, a_ref, *, H, W):
    s1 = s1_ref[...].reshape(1, 1, LANE)                      # bf16
    b1 = b1_ref[...].reshape(1, 1, LANE)
    # zero only the 4 halo strips of the padded activation scratch; interior overwritten below
    zrow = jnp.zeros((1, W + 2, LANE), a_ref.dtype)
    zcol = jnp.zeros((H, 1, LANE), a_ref.dtype)
    a_ref[0:1, :, :] = zrow
    a_ref[H + 1:H + 2, :, :] = zrow
    a_ref[1:H + 1, 0:1, :] = zcol
    a_ref[1:H + 1, W + 1:W + 2, :] = zcol
    a_ref[1:H + 1, 1:W + 1, :] = jnp.maximum(y1_ref[0] * s1 + b1, 0.0)   # bn1 + relu (bf16)

    # fused im2col: 9 shifted windows stacked along K -> one long-K MXU dot
    wins = [a_ref[ky:ky + H, kx:kx + W, :].reshape(H * W, LANE)
            for ky in range(3) for kx in range(3)]
    big = jnp.concatenate(wins, axis=-1)                      # (HW, 9*128) bf16
    acc = jnp.dot(big, w2_ref[0], preferred_element_type=jnp.float32)

    y2_ref[0] = acc.astype(y2_ref.dtype)
    ssum_ref[0] = jnp.sum(acc, axis=0, keepdims=True)
    ssq_ref[0] = jnp.sum(acc * acc, axis=0, keepdims=True)


def conv2_grouped(y1_4d, w2k, scale1, shift1, H, W):
    N = y1_4d.shape[0]
    wp = y1_4d.shape[3]
    nblk = wp // LANE
    hw = H * W
    kernel = functools.partial(_conv2_kernel, H=H, W=W)
    return pl.pallas_call(
        kernel,
        grid=(nblk, N),
        in_specs=[
            pl.BlockSpec((1, H, W, LANE), lambda c, n: (n, 0, 0, c)),
            pl.BlockSpec((1, 9 * LANE, LANE), lambda c, n: (c, 0, 0)),
            pl.BlockSpec((1, LANE), lambda c, n: (0, c)),
            pl.BlockSpec((1, LANE), lambda c, n: (0, c)),
        ],
        out_specs=[
            pl.BlockSpec((1, hw, LANE), lambda c, n: (n, 0, c)),
            pl.BlockSpec((1, 1, LANE), lambda c, n: (n, 0, c)),
            pl.BlockSpec((1, 1, LANE), lambda c, n: (n, 0, c)),
        ],
        out_shape=[jax.ShapeDtypeStruct((N, hw, wp), jnp.bfloat16),
                   jax.ShapeDtypeStruct((N, 1, wp), jnp.float32),
                   jax.ShapeDtypeStruct((N, 1, wp), jnp.float32)],
        scratch_shapes=[pltpu.VMEM((H + 2, W + 2, LANE), jnp.bfloat16)],
        compiler_params=_cparams(("parallel", "parallel")),
    )(y1_4d, w2k, scale1, shift1)


# ---------------------------------------------------------------------------
# Pass 3: fused [bn2 + ReLU] -> conv3 (1x1), HW-tiled; the per-tile sum doubles as the SE avg-pool
# ---------------------------------------------------------------------------
def _conv3_kernel(y2_ref, w3_ref, s2_ref, b2_ref, y3_ref, ssum_ref, ssq_ref):
    a = jnp.maximum(y2_ref[0] * s2_ref[...] + b2_ref[...], 0.0)          # bf16 prologue
    acc = jnp.dot(a, w3_ref[...], preferred_element_type=jnp.float32)
    y3_ref[0] = acc.astype(y3_ref.dtype)
    ssum_ref[0, 0] = jnp.sum(acc, axis=0, keepdims=True)
    ssq_ref[0, 0] = jnp.sum(acc * acc, axis=0, keepdims=True)


def conv3_matmul(y2, w3p, scale2, shift2, tile_hw):
    N, hw, wp = y2.shape
    cp = w3p.shape[1]
    nt = hw // tile_hw
    return pl.pallas_call(
        _conv3_kernel,
        grid=(N, nt),
        in_specs=[
            pl.BlockSpec((1, tile_hw, wp), lambda n, t: (n, t, 0)),
            pl.BlockSpec((wp, cp), lambda n, t: (0, 0)),
            pl.BlockSpec((1, wp), lambda n, t: (0, 0)),
            pl.BlockSpec((1, wp), lambda n, t: (0, 0)),
        ],
        out_specs=[
            pl.BlockSpec((1, tile_hw, cp), lambda n, t: (n, t, 0)),
            pl.BlockSpec((1, 1, 1, cp), lambda n, t: (n, t, 0, 0)),
            pl.BlockSpec((1, 1, 1, cp), lambda n, t: (n, t, 0, 0)),
        ],
        out_shape=[jax.ShapeDtypeStruct((N, hw, cp), jnp.bfloat16),
                   jax.ShapeDtypeStruct((N, nt, 1, cp), jnp.float32),
                   jax.ShapeDtypeStruct((N, nt, 1, cp), jnp.float32)],
        compiler_params=_cparams(("parallel", "parallel")),
    )(y2, w3p, scale2, shift2)


# ---------------------------------------------------------------------------
# Pass 4: bn3 + SE channel gate + identity residual + final ReLU (elementwise, bf16 in/out)
# ---------------------------------------------------------------------------
def _se_apply_kernel(y3_ref, gate_ref, s3_ref, b3_ref, res_ref, o_ref):
    y = y3_ref[0].astype(jnp.float32) * s3_ref[...] + b3_ref[...]
    o = jnp.maximum(y * gate_ref[0] + res_ref[0].astype(jnp.float32), 0.0)
    o_ref[0] = o.astype(o_ref.dtype)


def se_apply(y3, gate, scale3, shift3, res, tile_hw):
    N, hw, cp = y3.shape
    nt = hw // tile_hw
    return pl.pallas_call(
        _se_apply_kernel,
        grid=(N, nt),
        in_specs=[
            pl.BlockSpec((1, tile_hw, cp), lambda n, t: (n, t, 0)),
            pl.BlockSpec((1, 1, cp), lambda n, t: (n, 0, 0)),
            pl.BlockSpec((1, cp), lambda n, t: (0, 0)),
            pl.BlockSpec((1, cp), lambda n, t: (0, 0)),
            pl.BlockSpec((1, tile_hw, cp), lambda n, t: (n, t, 0)),
        ],
        out_specs=pl.BlockSpec((1, tile_hw, cp), lambda n, t: (n, t, 0)),
        out_shape=jax.ShapeDtypeStruct((N, hw, cp), jnp.bfloat16),
        compiler_params=_cparams(("parallel", "parallel")),
    )(y3, gate, scale3, shift3, res)


# ---------------------------------------------------------------------------
# Tiny XLA glue: finalize batch-stat BN scale/shift from the partial sums
# ---------------------------------------------------------------------------
def _bn_scale_shift(ssum_p, ssq_p, gamma_p, beta_p, count):
    s0 = jnp.sum(ssum_p, axis=tuple(range(ssum_p.ndim - 1)))        # (C,)
    s1 = jnp.sum(ssq_p, axis=tuple(range(ssq_p.ndim - 1)))          # (C,)
    mean = s0 / count
    var = jnp.maximum(s1 / count - mean * mean, 0.0)
    scale = gamma_p * lax.rsqrt(var + EPS)
    shift = beta_p - mean * scale
    return scale.reshape(1, -1), shift.reshape(1, -1)


# ---------------------------------------------------------------------------
# Full block forward (glue between the 4 fused passes)
# ---------------------------------------------------------------------------
def se_resnext_bottleneck_forward(x_nhwc, kp, *, tile_m=None, tile_hw=None):
    N, H, W, cin = x_nhwc.shape
    HW = H * W
    M = N * HW
    cin_p, wp = kp["w1p"].shape
    cp = kp["w3p"].shape[1]
    cout = kp["cout"]
    assert cin_p == cp, "identity shortcut requires inplanes == planes*expansion"

    # lane-pad the input once; bf16 for the conv1 matmul and for the residual add (pass 4 is
    # memory-bound, bf16 residual/output halves its HBM traffic)
    xpad = jnp.pad(x_nhwc, ((0, 0), (0, 0), (0, 0), (0, cin_p - cin))).astype(jnp.bfloat16)
    x2d = xpad.reshape(M, cin_p)
    res = xpad.reshape(N, HW, cin_p)

    tm = min(tile_m or _default_tile_m(), M)
    tm = math.gcd(tm, M)
    assert tm % 16 == 0, "pass-1 tile_m must be a multiple of 16 (bf16 sublane tile)"

    th = min(tile_hw or 2048, HW)
    th = math.gcd(th, HW)
    assert th % 16 == 0, "pass-3/4 tile_hw must be a multiple of 16 (bf16 sublane tile)"

    # pass 1: conv1 (lane-dense (M, width) output; no spatial pad round-trip in HBM)
    y1, s1sum, s1sq = conv1_matmul(x2d, kp["w1p"], tm)
    scale1, shift1 = _bn_scale_shift(s1sum, s1sq, kp["g1"], kp["b1"], M)

    # pass 2: bn1+relu -> grouped 3x3 conv (padding re-created in VMEM scratch, fused im2col)
    y2, s2sum, s2sq = conv2_grouped(y1.reshape(N, H, W, wp), kp["w2k"],
                                    scale1.astype(jnp.bfloat16), shift1.astype(jnp.bfloat16),
                                    H, W)
    scale2, shift2 = _bn_scale_shift(s2sum, s2sq, kp["g2"], kp["b2"], M)

    # pass 3: bn2+relu -> conv3 (HW-tiled; per-tile sums double as the SE avg-pool accumulator)
    y3, s3sum, s3sq = conv3_matmul(y2, kp["w3p"],
                                   scale2.astype(jnp.bfloat16), shift2.astype(jnp.bfloat16), th)
    scale3, shift3 = _bn_scale_shift(s3sum, s3sq, kp["g3"], kp["b3"], M)

    # SE gating FCs on the pooled vector (tiny (N, cout) ops) — XLA glue.
    # mean_hw(bn3(y3)) == scale3 * mean_hw(y3) + shift3  (affine commutes with the mean)
    pooled = jnp.sum(s3sum, axis=(1, 2)) / HW                        # (N, cp)
    s_vec = pooled * scale3 + shift3
    h = jax.nn.relu(s_vec[:, :cout] @ kp["fc1_wt"] + kp["fc1_b"])
    g = jax.nn.sigmoid(h @ kp["fc2_wt"] + kp["fc2_b"])
    gate = jnp.zeros((N, 1, cp), jnp.float32).at[:, 0, :cout].set(g)

    # pass 4: bn3 * gate + residual, relu
    out = se_apply(y3, gate, scale3, shift3, res, th)
    return out.reshape(N, H, W, cp)[..., :cout]


# ---------------------------------------------------------------------------
# Deterministic parameter init (shapes per SEResNeXtBottleneck.__init__) + kernel-layout prep
# ---------------------------------------------------------------------------
def init_raw_params(key, inplanes, planes, groups, base_width, reduction):
    expansion = 4
    width = int(planes * (base_width / 64.0)) * groups
    cout = planes * expansion
    cr = cout // reduction
    ks = jax.random.split(key, 13)

    def rnd(k, shape, scale=0.1):
        return scale * jax.random.normal(k, shape, jnp.float32)

    return dict(
        w1=rnd(ks[0], (width, inplanes)),                    # conv1 (O, I, 1, 1) squeezed
        w2=rnd(ks[1], (width, width // groups, 3, 3)),       # conv2 grouped (O, I/g, 3, 3)
        w3=rnd(ks[2], (cout, width)),                        # conv3 (O, I, 1, 1) squeezed
        g1=1.0 + rnd(ks[3], (width,)), b1=rnd(ks[4], (width,)),
        g2=1.0 + rnd(ks[5], (width,)), b2=rnd(ks[6], (width,)),
        g3=1.0 + rnd(ks[7], (cout,)), b3=rnd(ks[8], (cout,)),
        fc1_w=rnd(ks[9], (cr, cout)), fc1_b=rnd(ks[10], (cr,)),
        fc2_w=rnd(ks[11], (cout, cr)), fc2_b=rnd(ks[12], (cout,)),
        width=width, cout=cout, groups=groups,
    )


def prepare_kernel_params(raw, inplanes):
    width, cout, groups = raw["width"], raw["cout"], raw["groups"]
    cpg = width // groups
    cin_p, wp, cp = _pad_to(inplanes), _pad_to(width), _pad_to(cout)
    nblk = wp // LANE
    # a ResNeXt group must live entirely inside one 128-lane channel block
    # TODO(synk): cross-block accumulation for configs with width//groups > 128 is not implemented.
    assert LANE % cpg == 0, "group width must divide the 128-lane channel block"

    w1p = jnp.zeros((cin_p, wp), jnp.float32).at[:inplanes, :width].set(raw["w1"].T)
    w3p = jnp.zeros((wp, cp), jnp.float32).at[:width, :cout].set(raw["w3"].T)

    # grouped 3x3 conv weights laid out for the single long-K dot:
    # rows t*128 + (in-channel within block), cols = out-channel within block, block-diag per group
    w2 = np.asarray(raw["w2"])
    w2k = np.zeros((nblk, 9 * LANE, LANE), np.float32)
    for t in range(9):
        ky, kx = divmod(t, 3)
        for g in range(groups):
            lo = g * cpg
            blk, loc = divmod(lo, LANE)
            w2k[blk, t * LANE + loc:t * LANE + loc + cpg, loc:loc + cpg] = \
                w2[lo:lo + cpg, :, ky, kx].T

    def padvec(v, n):
        return jnp.zeros((n,), jnp.float32).at[:v.shape[0]].set(v)

    return dict(
        w1p=w1p.astype(jnp.bfloat16),
        w2k=jnp.asarray(w2k).astype(jnp.bfloat16),
        w3p=w3p.astype(jnp.bfloat16),
        g1=padvec(raw["g1"], wp), b1=padvec(raw["b1"], wp),
        g2=padvec(raw["g2"], wp), b2=padvec(raw["b2"], wp),
        g3=padvec(raw["g3"], cp), b3=padvec(raw["b3"], cp),
        fc1_wt=raw["fc1_w"].T, fc1_b=raw["fc1_b"],
        fc2_wt=raw["fc2_w"].T, fc2_b=raw["fc2_b"],
        cout=cout,
    )


# ---------------------------------------------------------------------------
# Pure-JAX f32 reference (lax.conv for the grouped conv) for correctness check
# ---------------------------------------------------------------------------
def reference_forward(x_nhwc, raw):
    groups = raw["groups"]

    def bn(y, g, b):
        m = jnp.mean(y, axis=(0, 1, 2), keepdims=True)
        v = jnp.mean((y - m) ** 2, axis=(0, 1, 2), keepdims=True)
        return (y - m) / jnp.sqrt(v + EPS) * g + b

    y1 = jnp.einsum("nhwc,oc->nhwo", x_nhwc, raw["w1"])
    y1 = jax.nn.relu(bn(y1, raw["g1"], raw["b1"]))
    w2_hwio = jnp.transpose(raw["w2"], (2, 3, 1, 0))
    y2 = lax.conv_general_dilated(y1, w2_hwio, (1, 1), "SAME",
                                  dimension_numbers=("NHWC", "HWIO", "NHWC"),
                                  feature_group_count=groups)
    y2 = jax.nn.relu(bn(y2, raw["g2"], raw["b2"]))
    y3 = jnp.einsum("nhwc,oc->nhwo", y2, raw["w3"])
    y3 = bn(y3, raw["g3"], raw["b3"])
    s = jnp.mean(y3, axis=(1, 2))
    h = jax.nn.relu(s @ raw["fc1_w"].T + raw["fc1_b"])
    g = jax.nn.sigmoid(h @ raw["fc2_w"].T + raw["fc2_b"])
    return jax.nn.relu(y3 * g[:, None, None, :] + x_nhwc)


if __name__ == "__main__":
    # Small config consistent with the module defaults (groups must divide width):
    #   planes=32, groups=32, base_width=8 -> width = int(32*8/64)*32 = 128 ; expansion=4 -> cout=128
    #   inplanes = planes*4 = 128 (identity residual, downsample=None), stride=1
    N, H, W = 2, 8, 8
    planes, groups, base_width, reduction = 32, 32, 8, 16
    inplanes = planes * 4

    key = jax.random.PRNGKey(0)
    kx, kparam = jax.random.split(key)
    x_nchw = jax.random.normal(kx, (N, inplanes, H, W), jnp.float32)   # PyTorch NCHW input
    x_nhwc = jnp.transpose(x_nchw, (0, 2, 3, 1))                       # kernel layout NHWC

    raw = init_raw_params(kparam, inplanes, planes, groups, base_width, reduction)
    kp = prepare_kernel_params(raw, inplanes)

    # tile_m=64 / tile_hw=32 exercise multi-step grids even at this toy size
    out = se_resnext_bottleneck_forward(x_nhwc, kp, tile_m=64, tile_hw=32)
    out = jax.block_until_ready(out)

    ref = reference_forward(x_nhwc, raw)
    assert out.shape == ref.shape == (N, H, W, planes * 4)
    max_err = float(jnp.max(jnp.abs(out.astype(jnp.float32) - ref)))
    # bf16 matmul operands, bf16 prologues/residual/output (f32 accumulation) vs all-f32 reference
    if max_err < 2e-1:
        print("KERNEL_OK")
    else:
        print(f"MISMATCH max_abs_err={max_err}")
</pallas_src>

<mosaic_0001>
module attributes {stable_mosaic.version = 11 : i64} {
  func.func @_conv1_kernel(%arg0: i32, %arg1: memref<64x128xbf16, #tpu.memory_space<vmem>>, %arg2: memref<128x128xbf16, #tpu.memory_space<vmem>>, %arg3: memref<64x128xbf16, #tpu.memory_space<vmem>>, %arg4: memref<1x1x128xf32, #tpu.memory_space<vmem>>, %arg5: memref<1x1x128xf32, #tpu.memory_space<vmem>>) attributes {dimension_semantics = [#tpu.dimension_semantics<parallel>], iteration_bounds = array<i64: 2>, scalar_prefetch = 0 : i64, scratch_operands = 0 : i64, tpu.core_type = #tpu.core_type<tc>, window_params = [{transform_indices = @transform_0, window_bounds = array<i64: 64, 128>}, {pipeline_mode = #tpu.pipeline_mode<synchronous>, transform_indices = @transform_1, window_bounds = array<i64: 128, 128>}, {transform_indices = @transform_2, window_bounds = array<i64: 64, 128>}, {transform_indices = @transform_3, window_bounds = array<i64: 1, 1, 128>}, {transform_indices = @transform_4, window_bounds = array<i64: 1, 1, 128>}]} {
    %c0 = arith.constant 0 : index
    %c0_0 = arith.constant 0 : index
    %0 = vector.load %arg1[%c0, %c0_0] : memref<64x128xbf16, #tpu.memory_space<vmem>>, vector<64x128xbf16>
    %c0_1 = arith.constant 0 : index
    %c0_2 = arith.constant 0 : index
    %1 = vector.load %arg2[%c0_1, %c0_2] : memref<128x128xbf16, #tpu.memory_space<vmem>>, vector<128x128xbf16>
    %cst = arith.constant dense<0.000000e+00> : vector<64x128xf32>
    %2 = tpu.matmul %0, %1, %cst {dimension_numbers = #tpu.dot_dimension_numbers<[1], [0], [0], [1], [0, 0, 1, 1], [], []>} : vector<64x128xbf16>, vector<128x128xbf16>, vector<64x128xf32> -> vector<64x128xf32>
    %3 = arith.truncf %2 : vector<64x128xf32> to vector<64x128xbf16>
    %c0_3 = arith.constant 0 : index
    %c0_4 = arith.constant 0 : index
    %4 = vector.load %arg3[%c0_3, %c0_4] : memref<64x128xbf16, #tpu.memory_space<vmem>>, vector<64x128xbf16>
    tpu.vector_store %arg3[%c0_3, %c0_4], %3 {strides = array<i32>} : memref<64x128xbf16, #tpu.memory_space<vmem>>, vector<64x128xbf16>,
    %cst_5 = arith.constant dense<0.000000e+00> : vector<128xf32>
    %5 = vector.multi_reduction <add>, %2, %cst_5 [0] : vector<64x128xf32> to vector<128xf32>
    %6 = vector.shape_cast %5 : vector<128xf32> to vector<1x128xf32>
    %c0_6 = arith.constant 0 : index
    %c0_7 = arith.constant 0 : index
    %c0_8 = arith.constant 0 : index
    %7 = vector.load %arg4[%c0_6, %c0_7, %c0_8] : memref<1x1x128xf32, #tpu.memory_space<vmem>>, vector<1x1x128xf32>
    %8 = vector.shape_cast %7 : vector<1x1x128xf32> to vector<1x128xf32>
    %9 = vector.shape_cast %6 : vector<1x128xf32> to vector<1x1x128xf32>
    tpu.vector_store %arg4[%c0_6, %c0_7, %c0_8], %9 {strides = array<i32>} : memref<1x1x128xf32, #tpu.memory_space<vmem>>, vector<1x1x128xf32>,
    %10 = arith.mulf %2, %2 : vector<64x128xf32>
    %cst_9 = arith.constant dense<0.000000e+00> : vector<128xf32>
    %11 = vector.multi_reduction <add>, %10, %cst_9 [0] : vector<64x128xf32> to vector<128xf32>
    %12 = vector.shape_cast %11 : vector<128xf32> to vector<1x128xf32>
    %c0_10 = arith.constant 0 : index
    %c0_11 = arith.constant 0 : index
    %c0_12 = arith.constant 0 : index
    %13 = vector.load %arg5[%c0_10, %c0_11, %c0_12] : memref<1x1x128xf32, #tpu.memory_space<vmem>>, vector<1x1x128xf32>
    %14 = vector.shape_cast %13 : vector<1x1x128xf32> to vector<1x128xf32>
    %15 = vector.shape_cast %12 : vector<1x128xf32> to vector<1x1x128xf32>
    tpu.vector_store %arg5[%c0_10, %c0_11, %c0_12], %15 {strides = array<i32>} : memref<1x1x128xf32, #tpu.memory_space<vmem>>, vector<1x1x128xf32>,
    return
  }
  func.func @transform_0(%arg0: i32) -> (i32, i32) {
    %c0_i32 = arith.constant 0 : i32
    %c0_i32_0 = arith.constant 0 : i32
    return %arg0, %c0_i32 : i32, i32
  }
  func.func @transform_1(%arg0: i32) -> (i32, i32) {
    %c0_i32 = arith.constant 0 : i32
    %c0_i32_0 = arith.constant 0 : i32
    %c0_i32_1 = arith.constant 0 : i32
    return %c0_i32, %c0_i32_0 : i32, i32
  }
  func.func @transform_2(%arg0: i32) -> (i32, i32) {
    %c0_i32 = arith.constant 0 : i32
    %c0_i32_0 = arith.constant 0 : i32
    return %arg0, %c0_i32 : i32, i32
  }
  func.func @transform_3(%arg0: i32) -> (i32, i32, i32) {
    %c0_i32 = arith.constant 0 : i32
    %c0_i32_0 = arith.constant 0 : i32
    %c0_i32_1 = arith.constant 0 : i32
    return %arg0, %c0_i32, %c0_i32_0 : i32, i32, i32
  }
  func.func @transform_4(%arg0: i32) -> (i32, i32, i32) {
    %c0_i32 = arith.constant 0 : i32
    %c0_i32_0 = arith.constant 0 : i32
    %c0_i32_1 = arith.constant 0 : i32
    return %arg0, %c0_i32, %c0_i32_0 : i32, i32, i32
  }
}

</mosaic_0001>

<bundles_post_ra>
// kernel: tpu_custom_call.1
= control target key start
LH: loop header
LB: loop body
LE: loop exit
PB: predicated region body
PF: predicated region fallthrough
CT: control target
= control target key end

     0   :  { %10 = vsyncpa [#allocation3], 0  ;;  %s1360_s0 = inlined_call_operand.hbm [shape: bf16[128,128], index: 0, kind: input, shape index: {}]   ;;  %s1361_s1 = inlined_call_operand.hbm [shape: bf16[128,128], index: 1, kind: input, shape index: {}]   ;;  %s1362_s2 = inlined_call_operand.hbm [shape: bf16[128,128], index: 2, kind: output, shape index: {0}]   ;;  %s1363_s3 = inlined_call_operand.hbm [shape: f32[2,1,128], index: 3, kind: output, shape index: {1}]   ;;  %s1364_s4 = inlined_call_operand.hbm [shape: f32[2,1,128], index: 4, kind: output, shape index: {2}]  }
   0x1   :  { %12 = vsyncpa [#allocation3 + $0x1], 0 }
   0x2   :  { %13 = vsyncpa [#allocation6], 0 }
   0x3   :  { %14 = vsyncpa [#allocation4], 0 }
   0x4   :  { %16 = vsyncpa [#allocation4 + $0x1], 0 }
   0x5   :  { %17 = vsyncpa [#allocation9], 0 }
   0x6   :  { %19 = vsyncpa [#allocation9 + $0x1], 0  ;;  %s1091_s15 = smov 0   ;;  %s1093_s16 = smov 0  }
   0x7   :  { %s1095_s17 = smov 0   ;;  %s1097_s18 = smov 0  }
   0x8 LB: > { %s1112_s19 = sadd.s32 4294967295, %s1055_s18   ;;  %s1366_s20 = sadd.s32 4294967294, %s1055_s18   ;;  %s1055_s18 = sphi %s1097_s18, %s1388_s18   ;;  %s1051_s17 = sphi %s1095_s17, %s1387_s17   ;;  %s1047_s16 = sphi %s1093_s16, %s1386_s16   ;;  %s1043_s15 = sphi %s1091_s15, %s1385_s15  }
   0x9   : > { %p45_p0 = scmp.ne.s32.totalorder %s1047_s16, %s1043_s15  ;;  %p1365_p1 = scmp.eq.s32.totalorder %s1112_s19, 0 }
   0xa   : > { %p96_p3 = scmp.eq.s32.totalorder %s1366_s20, 1  ;;  %p672_p5 = scmp.ge.s32.totalorder %s1055_s18, 1 }
   0xb   : > { %p1123_p4 = por %p1365_p1, %p45_p0  ;;  %p155_p7 = scmp.lt.s32.totalorder %s1055_s18, 3 }
   0xc   : > { %p1128_p6 = por %p96_p3, %p45_p0  ;;  %s1057_s24 = smov [#allocation5]  }
   0xd   : > { %s1370_s21 = scalar_select %p1123_p4, 1, 0 }
   0xe   : > { %s1371_s22 = scalar_select %p1128_p6, 1, 0 }
   0xf   : > { %p1133_p8 = pnand %p672_p5, %p155_p7  ;;  %s167_s25 = sshll.u32 %s1057_s24, 4  ;;  %s168_s25 = int_to_ptr.vmem [resolvable:$true] %s167_s25 }
  0x10   : > { %s1147_s27 = sadd.s32 1, %s1055_s18   ;;  %s32_s28 = sadd.s32 1, %s1051_s17 }
  0x11   : > { %s1372_s23 = scalar_select %p1133_p8, 1, 0 }
  0x12   : > { %p806_p9 = pneg %p1133_p8  ;;  %s29_s29 = ssub.s32 %s1055_s18, %s1147_s27 }
  0x13   : > { %s888_s30 = scalar_lea.vmem %s168_s25, 1024  ;;  %p896_p5 = scmp.lt.s32.totalorder %s168_s25, %s168_s25 }
  0x14   : > { %p1142_p11 = pnand %p806_p9, %p1365_p1  ;;  %p889_p13 = scmp.ne.s32.totalorder %s168_s25, %s888_s30 }
  0x15   : > { %p897_p7 = scmp.lt.s32.totalorder %s888_s30, %s888_s30 }
  0x16   : > { %p879_p12 = pneg %p1142_p11 }
  0x17   : > { %p898_p10 = por %p897_p7, %p896_p5 }
  0x18   : > { %p891_p0 = pnand %p889_p13, %p879_p12 }
  0x1a   : > { %p892_p3 = pneg %p891_p0 }
  0x1c   : > { %p899_p2 = pnand %p898_p10, %p892_p3 }
  0x1e   : > { %902 = shalt.err (!%p899_p2)
}
  0x1f   : > { %s1058_s5 = smov 64   ;;  %s1059_s6 = smov 4  }
  0x20   : > { %809 = dma.hbm_to_vmem [thread:$0]  (!%p1142_p11), %s1361_s1, 1024, %s168_s25, [#allocation6], %s1058_s5, %s1058_s5, %s1059_s6  }
  0x21   : > { %p30_p2 = scmp.eq.s32.totalorder %s29_s29, 0  ;;  %p39_p9 = scmp.ne.s32.totalorder %s1051_s17, %s1047_s16 }
  0x22   : > { %p40_p10 = scmp.eq.s32.totalorder %s1055_s18, 0  ;;  %p825_p12 = scmp.lt.s32.totalorder %s1055_s18, 2 }
  0x23   : > { %s1167_s9 = scalar_select %p30_p2, %s1051_s17, %s32_s28  }
  0x24   : > { %p41_p13 = por %p40_p10, %p39_p9  ;;  %p1374_p0 = scmp.eq.s32.totalorder %s1112_s19, 1 }
  0x25   : > { %s181_s11 = sand.u32 1, %s1051_s17   ;;  %s709_s12 = sshll.u32 %s1055_s18, 9 }
  0x26   : > { %p1171_p3 = por %p1374_p0, %p39_p9  ;;  %s675_s13 = sshll.u32 %s181_s11, 5 }
  0x27   : > { %s1180_s26 = scalar_lea.hbm %s1360_s0, %s709_s12  ;;  %s185_s25 = scalar_lea.vmem [#allocation2], %s675_s13 }
  0x28   : > { %s1375_s10 = scalar_select %p1171_p3, 1, 0 }
  0x29   : > { %s192_s28 = sshll.u32 %s185_s25, 4  ;;  %p1182_p11 = pnand %p825_p12, %p41_p13  ;;  %s1186_s28 = int_to_ptr.vmem [resolvable:$true] %s192_s28 }
  0x2a   : > { %s1188_s30 = scalar_lea.sflag [#allocation3], %s181_s11  ;;  %s903_s7 = scalar_lea.hbm %s1180_s26, 512 }
  0x2b   : > { %p904_p5 = scmp.ne.s32.totalorder %s1180_s26, %s903_s7  ;;  %p905_p7 = pneg %p1182_p11 }
  0x2c   : > { %s908_s13 = scalar_lea.hbm %s1360_s0, 1024  ;;  %p909_p10 = scmp.lt.s32.totalorder %s1180_s26, %s1360_s0 }
  0x2d   : > { %p906_p2 = pnand %p905_p7, %p904_p5  ;;  %p910_p12 = scmp.lt.s32.totalorder %s908_s13, %s903_s7 }
  0x2f   : > { %p907_p9 = pneg %p906_p2  ;;  %p911_p13 = por %p910_p12, %p909_p10 }
  0x31   : > { %p912_p0 = pnand %p911_p13, %p907_p9 }
  0x33   : > { %915 = shalt.err (!%p912_p0)
}
  0x34   : > { %s916_s11 = scalar_lea.vmem %s1186_s28, 512  ;;  %s1060_s25 = smov [#allocation2]  }
  0x35   : > { %p917_p1 = scmp.ne.s32.totalorder %s1186_s28, %s916_s11  ;;  %s921_s20 = sshll.u32 %s1060_s25, 4  ;;  %s922_s20 = int_to_ptr.vmem [resolvable:$false] %s921_s20 }
  0x36   : > { %s923_s8 = scalar_lea.vmem %s922_s20, 1024  ;;  %p924_p2 = scmp.lt.s32.totalorder %s1186_s28, %s922_s20 }
  0x37   : > { %p919_p6 = pnand %p917_p1, %p905_p7  ;;  %p925_p3 = scmp.lt.s32.totalorder %s923_s8, %s916_s11 }
  0x39   : > { %p920_p5 = pneg %p919_p6  ;;  %p926_p4 = por %p925_p3, %p924_p2 }
  0x3b   : > { %p927_p8 = pnand %p926_p4, %p920_p5 }
  0x3d   : > { %930 = shalt.err (!%p927_p8)
}
  0x3e   : > { %813 = dma.hbm_to_vmem [thread:$0]  (!%p1182_p11), %s1180_s26, 512, %s1186_s28, %s1188_s30, %s1058_s5, %s1058_s5, %s1059_s6  }
  0x3f   : > { %p1377_p1 = scmp.ne.s32.totalorder %s1372_s23, 0 }
  0x40   : > { %s1215_s7 = sand.u32 (!%p1377_p1), 1, %s1047_s16   ;;  %p1378_p4 = scmp.ne.s32.totalorder (!%p1377_p1), %s1370_s21, 0 }
  0x41   : > { %204 = sbr.rel (%p1377_p1) target bundleno = 377 (0x179), region = 28  ;;  %s679_s20 = sshll.u32 (!%p1377_p1), %s1215_s7, 5 }
  0x42   : > { %s207_s12 = scalar_lea.sflag (!%p1377_p1), [#allocation3], %s1215_s7  ;;  %s1221_s29 = scalar_lea.vmem (!%p1377_p1), [#allocation2], %s679_s20 }
  0x46   : > { %1026 = dma.done.wait (%p1378_p4), %s207_s12, 512  }
  0x47   : > { %1028 = vsyncadd (%p1378_p4), %s207_s12, 4294966784  ;;  %p1379_p6 = scmp.eq.s32.totalorder %s1112_s19, 0 }
  0x49   : > { %1030 = dma.done.wait (%p1379_p6), [#allocation6], 1024   ;;  %p1380_p8 = pmov %p1379_p6 }
  0x4a   : > { %v865_v0 = vld [vmem:[#allocation5 + $0x38] sm:$0xff]   ;;  %v866_v1 = vld [vmem:[#allocation5 + $0x30] sm:$0xff]   ;;  %v867_v2 = vld [vmem:[#allocation5 + $0x28] sm:$0xff]   ;;  %s234_s21 = scalar_lea.vmem [#allocation7], %s679_s20  ;;  %s718_s5 = sshll.u32 %s1112_s19, 9 }
  0x4b   : > { %1032 = vsyncadd (%p1380_p8), [#allocation6], 4294966272  ;;  %754 = vmatprep.subr.bf16.mxu0 %v865_v0  ;;  %778 = vmatprep.subr.bf16.mxu1 %v865_v0  ;;  %v868_v3 = vld [vmem:[#allocation5 + $0x20] sm:$0xff]   ;;  %v875_v5 = vld [vmem:[%s1221_s29 + $0x10] sm:$0xff]   ;;  %s509_s23 = sshll.u32 %s234_s21, 4  ;;  %s1246_s28 = scalar_lea.hbm %s1362_s2, %s718_s5  ;;  %s1240_s23 = int_to_ptr.vmem [resolvable:$true] %s509_s23 }
  0x4c   : > { %755 = vmatpush3.bf16.msra.mxu0 %v865_v0  ;;  %786 = vmatpush3.bf16.msra.mxu1 %v865_v0  ;;  %v873_v4 = vld [vmem:[%s1221_s29] sm:$0xff]   ;;  %v869_v6 = vld [vmem:[#allocation5 + $0x18] sm:$0xff]   ;;  %v870_v7 = vld [vmem:[#allocation5 + $0x10] sm:$0xff]   ;;  %s488_s30 = scalar_lea.sflag [#allocation4], %s1215_s7  ;;  %s931_s13 = scalar_lea.vmem %s1240_s23, 512 }
  0x4d   : > { %756 = vmatprep.subr.bf16.mxu0 %v866_v1  ;;  %779 = vmatprep.subr.bf16.mxu1 %v866_v1  ;;  %v871_v8 = vld [vmem:[#allocation5 + $0x8] sm:$0xff]   ;;  %v872_v9 = vld [vmem:[#allocation5] sm:$0xff]   ;;  %v876_v11 = vld [vmem:[%s1221_s29 + $0x18] sm:$0xff]   ;;  %p932_p3 = scmp.ne.s32.totalorder %s1240_s23, %s931_s13  ;;  %p1381_p11 = scmp.ne.s32.totalorder %s1375_s10, 0 }
  0x4e   : > { %770 = vmatprep.mubr.bf16.mxu0 %v873_v4  ;;  %774 = vmatprep.mubr.bf16.mxu1 %v875_v5  ;;  %v874_v10 = vld [vmem:[%s1221_s29 + $0x8] sm:$0xff]   ;;  %s1061_s14 = smov [#allocation7]  }
  0x4f   : > { %p933_p7 = pnand %p932_p3, %p1381_p11  ;;  %s935_s24 = sshll.u32 %s1061_s14, 4  ;;  %s936_s24 = int_to_ptr.vmem [resolvable:$false] %s935_s24 }
  0x50   : > { %757 = vmatpush3.bf16.msra.mxu0 %v866_v1  ;;  %787 = vmatpush3.bf16.msra.mxu1 %v866_v1  ;;  %s937_s11 = scalar_lea.vmem %s936_s24, 1024  ;;  %p938_p10 = scmp.lt.s32.totalorder %s1240_s23, %s936_s24 }
  0x51   : > { %758 = vmatprep.subr.bf16.mxu0 %v867_v2  ;;  %780 = vmatprep.subr.bf16.mxu1 %v867_v2  ;;  %p934_p9 = pneg %p933_p7  ;;  %p939_p12 = scmp.lt.s32.totalorder %s937_s11, %s931_s13 }
  0x53   : > { %p940_p13 = por %p939_p12, %p938_p10 }
  0x54   : > { %759 = vmatpush3.bf16.msra.mxu0 %v867_v2  ;;  %788 = vmatpush3.bf16.msra.mxu1 %v867_v2 }
  0x55   : > { %760 = vmatprep.subr.bf16.mxu0 %v868_v3  ;;  %781 = vmatprep.subr.bf16.mxu1 %v868_v3  ;;  %p941_p0 = pnand %p940_p13, %p934_p9 }
  0x58   : > { %761 = vmatpush3.bf16.msra.mxu0 %v868_v3  ;;  %789 = vmatpush3.bf16.msra.mxu1 %v868_v3 }
  0x59   : > { %762 = vmatprep.subr.bf16.mxu0 %v869_v6  ;;  %782 = vmatprep.subr.bf16.mxu1 %v869_v6 }
  0x5c   : > { %763 = vmatpush3.bf16.msra.mxu0 %v869_v6  ;;  %790 = vmatpush3.bf16.msra.mxu1 %v869_v6 }
  0x5d   : > { %764 = vmatprep.subr.bf16.mxu0 %v870_v7  ;;  %783 = vmatprep.subr.bf16.mxu1 %v870_v7 }
  0x60   : > { %765 = vmatpush3.bf16.msra.mxu0 %v870_v7  ;;  %791 = vmatpush3.bf16.msra.mxu1 %v870_v7 }
  0x61   : > { %766 = vmatprep.subr.bf16.mxu0 %v871_v8  ;;  %784 = vmatprep.subr.bf16.mxu1 %v871_v8 }
  0x64   : > { %767 = vmatpush3.bf16.msra.mxu0 %v871_v8  ;;  %792 = vmatpush3.bf16.msra.mxu1 %v871_v8 }
  0x65   : > { %768 = vmatprep.subr.bf16.mxu0 %v872_v9  ;;  %785 = vmatprep.subr.bf16.mxu1 %v872_v9 }
  0x68   : > { %769 = vmatpush3.bf16.msra.mxu0 %v872_v9  ;;  %793 = vmatpush3.bf16.msra.mxu1 %v872_v9 }
  0x6b   : > { %771 = vmatmul.mubr.bf16.vlgmr.msra.gmra.mxu0 %v874_v10  ;;  %775 = vmatmul.mubr.bf16.vlgmr.msra.gmra.mxu1 %v876_v11 }
 0x12b   : > { %v772_v12 = vpop.f32.mrf.mxu0  ;;  %v1235_v13 = vpop.f32.mrf.mxu1 }
 0x12c   : > { %v467_v27 = vmul.f32 %v772_v12, %v772_v12 }
 0x12d   : > { %v380_v14 = vpop.f32.mrf.mxu0  ;;  %v396_v15 = vpop.f32.mrf.mxu1 }
 0x12e   : > { %v465_v20 = vmul.f32 %v380_v14, %v380_v14 }
 0x12f   : > { %v773_v16 = vpop.f32.mrf.mxu0  ;;  %v777_v17 = vpop.f32.mrf.mxu1 }
 0x130   : > { %v727_v18 = vpack.c.bf16 %v773_v16, %v772_v12  ;;  %v737_v19 = vpack.c.bf16 %v777_v17, %v1235_v13 }
 0x131   : > { %v383_v21 = vpop.f32.mrf.mxu0  ;;  %v399_v22 = vpop.f32.mrf.mxu1 }
 0x132   : > { %739 = vst [vmem:[%s234_s21 + $0x8] sm:$0xff] %v727_v18   ;;  %v722_v23 = vpack.c.bf16 %v383_v21, %v380_v14  ;;  %v451_v24 = vadd.f32 %v383_v21, %v380_v14  ;;  %v466_v25 = vmul.f32 %v383_v21, %v383_v21  ;;  %741 = vst [vmem:[%s234_s21 + $0x18] sm:$0xff] %v737_v19  }
 0x133   : > { %v732_v26 = vpack.c.bf16 %v399_v22, %v396_v15 }
 0x134   : > { %723 = vst [vmem:[%s234_s21] sm:$0xff] %v722_v23   ;;  %v452_v28 = vadd.f32 %v772_v12, %v451_v24  ;;  %v473_v29 = vadd.f32 %v466_v25, %v465_v20 }
 0x135   : > { %740 = vst [vmem:[%s234_s21 + $0x10] sm:$0xff] %v732_v26  }
 0x136   : > { %944 = shalt.err (!%p941_p0)
}
 0x137   : > { %s945_s25 = scalar_lea.hbm %s1246_s28, 512  ;;  %s949_s12 = scalar_lea.hbm %s1362_s2, 1024 }
 0x138   : > { %p946_p5 = scmp.ne.s32.totalorder %s1246_s28, %s945_s25  ;;  %p950_p4 = scmp.lt.s32.totalorder %s1246_s28, %s1362_s2 }
 0x139   : > { %p951_p6 = scmp.lt.s32.totalorder %s949_s12, %s945_s25 }
 0x13a   : > { %p947_p2 = pnand %p946_p5, %p1381_p11 }
 0x13b   : > { %p952_p8 = por %p951_p6, %p950_p4 }
 0x13c   : > { %p948_p1 = pneg %p947_p2 }
 0x13e   : > { %p953_p3 = pnand %p952_p8, %p948_p1 }
 0x140   : > { %956 = shalt.err (!%p953_p3)
}
 0x141   : > { %s1062_s5 = smov 64   ;;  %s1063_s6 = smov 4   ;;  %v468_v30 = vmul.f32 %v773_v16, %v773_v16  ;;  %v474_v31 = vadd.f32 %v473_v29, %v467_v27  ;;  %v453_v32 = vadd.f32 %v773_v16, %v452_v28  ;;  %v469_v33 = vmul.f32 %v396_v15, %v396_v15 }
 0x142   : > { %800 = dma.vmem_to_hbm [thread:$0]  (%p1381_p11), %s1240_s23, 512, %s1246_s28, %s488_s30, %s1062_s5, %s1062_s5, %s1063_s6   ;;  %v470_v37 = vmul.f32 %v399_v22, %v399_v22  ;;  %v471_v39 = vmul.f32 %v1235_v13, %v1235_v13  ;;  %v472_v42 = vmul.f32 %v777_v17, %v777_v17 }
 0x143   : > { %v454_v34 = vadd.f32 %v453_v32, %v396_v15  ;;  %v475_v35 = vadd.f32 %v474_v31, %v468_v30  ;;  %s492_s23 = sand.u32 1, %s1112_s19   ;;  %s705_s26 = sshll.u32 %s1112_s19, 4 }
 0x144   : > { %s240_s28 = scalar_lea.vmem [#allocation8], %s1215_s7  ;;  %s246_s13 = scalar_lea.vmem [#allocation10], %s1215_s7 }
 0x145   : > { %v455_v36 = vadd.f32 %v454_v34, %v399_v22  ;;  %v476_v38 = vadd.f32 %v475_v35, %v469_v33  ;;  %s525_s30 = sshll.u32 %s240_s28, 4  ;;  %s538_s14 = sshll.u32 %s246_s13, 4  ;;  %s1285_s30 = int_to_ptr.vmem [resolvable:$true] %s525_s30  ;;  %s1292_s14 = int_to_ptr.vmem [resolvable:$true] %s538_s14 }
 0x146   : > { %s1283_s25 = scalar_lea.hbm %s1363_s3, %s705_s26  ;;  %s1290_s20 = scalar_lea.hbm %s1364_s4, %s705_s26 }
 0x147   : > { %v456_v40 = vadd.f32 %v1235_v13, %v455_v36  ;;  %v477_v41 = vadd.f32 %v476_v38, %v470_v37  ;;  %s1294_s12 = scalar_lea.sflag [#allocation9], %s492_s23  ;;  %s957_s29 = scalar_lea.vmem %s1285_s30, 16 }
 0x148   : > { %p958_p7 = scmp.ne.s32.totalorder %s1285_s30, %s957_s29  ;;  %s1064_s21 = smov [#allocation8]  }
 0x149   : > { %v457_v43 = vadd.f32 %v777_v17, %v456_v40  ;;  %v478_v44 = vadd.f32 %v477_v41, %v471_v39  ;;  %s961_s5 = sshll.u32 %s1064_s21, 4  ;;  %s962_s5 = int_to_ptr.vmem [resolvable:$false] %s961_s5 }
 0x14a   : > { %p959_p9 = pnand %p958_p7, %p1381_p11  ;;  %s963_s6 = scalar_lea.vmem %s962_s5, 32 }
 0x14b   : > { %v458_v45 = vrot.slane %v457_v43, 4  ;;  %v479_v46 = vadd.f32 %v478_v44, %v472_v42  ;;  %p964_p12 = scmp.lt.s32.totalorder %s1285_s30, %s962_s5  ;;  %p965_p13 = scmp.lt.s32.totalorder %s963_s6, %s957_s29 }
 0x14c   : > { %p960_p10 = pneg %p959_p9 }
 0x14d   : > { %v459_v47 = vadd.f32 %v458_v45, %v457_v43  ;;  %v480_v48 = vrot.slane %v479_v46, 4  ;;  %p966_p0 = por %p965_p13, %p964_p12 }
 0x14f   : > { %v460_v49 = vrot.slane %v459_v47, 2  ;;  %v481_v50 = vadd.f32 %v480_v48, %v479_v46  ;;  %p967_p5 = pnand %p966_p0, %p960_p10 }
 0x151   : > { %v461_v51 = vadd.f32 %v460_v49, %v459_v47  ;;  %v482_v52 = vrot.slane %v481_v50, 2 }
 0x153   : > { %v462_v53 = vrot.slane %v461_v51, 1  ;;  %v483_v54 = vadd.f32 %v482_v52, %v481_v50 }
 0x155   : > { %v484_v55 = vrot.slane %v483_v54, 1  ;;  %v463_v56 = vadd.f32 %v462_v53, %v461_v51 }
 0x157   : > { %464 = vst [vmem:[%s240_s28] sm:$0x1] %v463_v56  ;;  %v485_v57 = vadd.f32 %v484_v55, %v483_v54 }
 0x158   : > { %970 = shalt.err (!%p967_p5)
}
 0x159   : > { %s971_s23 = scalar_lea.hbm %s1283_s25, 16  ;;  %s975_s24 = scalar_lea.hbm %s1363_s3, 32 }
 0x15a   : > { %p972_p2 = scmp.ne.s32.totalorder %s1283_s25, %s971_s23  ;;  %p976_p6 = scmp.lt.s32.totalorder %s1283_s25, %s1363_s3 }
 0x15b   : > { %p977_p8 = scmp.lt.s32.totalorder %s975_s24, %s971_s23 }
 0x15c   : > { %p973_p1 = pnand %p972_p2, %p1381_p11 }
 0x15d   : > { %p978_p3 = por %p977_p8, %p976_p6 }
 0x15e   : > { %p974_p4 = pneg %p973_p1 }
 0x160   : > { %p979_p7 = pnand %p978_p3, %p974_p4 }
 0x162   : > { %982 = shalt.err (!%p979_p7)
}
 0x163   : > { %801 = dma.vmem_to_hbm [thread:$0]  (%p1381_p11), %s1285_s30, 16, %s1283_s25, %s1294_s12   ;;  %486 = vst [vmem:[%s246_s13] sm:$0x1] %v485_v57 }
 0x164   : > { %s983_s8 = scalar_lea.vmem %s1292_s14, 16  ;;  %s1065_s29 = smov [#allocation10]  }
 0x165   : > { %p984_p9 = scmp.ne.s32.totalorder %s1292_s14, %s983_s8  ;;  %s987_s21 = sshll.u32 %s1065_s29, 4  ;;  %s988_s21 = int_to_ptr.vmem [resolvable:$false] %s987_s21 }
 0x166   : > { %s989_s5 = scalar_lea.vmem %s988_s21, 32  ;;  %p990_p13 = scmp.lt.s32.totalorder %s1292_s14, %s988_s21 }
 0x167   : > { %p985_p10 = pnand %p984_p9, %p1381_p11  ;;  %p991_p0 = scmp.lt.s32.totalorder %s989_s5, %s983_s8 }
 0x169   : > { %p986_p12 = pneg %p985_p10  ;;  %p992_p5 = por %p991_p0, %p990_p13 }
 0x16b   : > { %p993_p2 = pnand %p992_p5, %p986_p12 }
 0x16d   : > { %996 = shalt.err (!%p993_p2)
}
 0x16e   : > { %s997_s7 = scalar_lea.hbm %s1290_s20, 16  ;;  %s1001_s25 = scalar_lea.hbm %s1364_s4, 32 }
 0x16f   : > { %p998_p1 = scmp.ne.s32.totalorder %s1290_s20, %s997_s7  ;;  %p1002_p8 = scmp.lt.s32.totalorder %s1290_s20, %s1364_s4 }
 0x170   : > { %p1003_p3 = scmp.lt.s32.totalorder %s1001_s25, %s997_s7 }
 0x171   : > { %p999_p4 = pnand %p998_p1, %p1381_p11 }
 0x172   : > { %p1004_p7 = por %p1003_p3, %p1002_p8 }
 0x173   : > { %p1000_p6 = pneg %p999_p4 }
 0x175   : > { %p1005_p9 = pnand %p1004_p7, %p1000_p6 }
 0x177   : > { %1008 = shalt.err (!%p1005_p9)
}
 0x178   : > { %802 = dma.vmem_to_hbm [thread:$0]  (%p1381_p11), %s1292_s14, 16, %s1290_s20, %s1294_s12  }
 0x179 PF: > { %s550_s26 = sand.u32 1, %s1043_s15   ;;  %p1382_p10 = scmp.ne.s32.totalorder %s1371_s22, 0 }
 0x17a   : > { %p1383_p12 = scmp.ge.s32.totalorder %s1055_s18, 2  ;;  %s551_s28 = scalar_lea.sflag [#allocation4], %s550_s26 }
 0x17c   : > { %p815_p13 = pnand %p1383_p12, %p1382_p10 }
 0x17e   : > { %p816_p0 = pneg %p815_p13 }
 0x180   : > { %1034 = dma.done.wait (%p816_p0), %s551_s28, 512  }
 0x181   : > { %1036 = vsyncadd (%p816_p0), %s551_s28, 4294966784  ;;  %s1384_s24 = sadd.s32 4294967294, %s1055_s18  }
 0x182   : > { %s559_s11 = sand.u32 1, %s1384_s24  }
 0x183   : > { %s560_s10 = scalar_lea.sflag [#allocation9], %s559_s11 }
 0x184   : > { %1038 = dma.done.wait (%p816_p0), %s560_s10, 32  }
 0x185   : > { %1040 = vsyncadd (%p816_p0), %s560_s10, 4294967264  ;;  %p22_p11 = scmp.ge.s32.totalorder %s1147_s27, 4   ;;  %s1385_s15 = smov %s1047_s16 }
 0x186   : > { %s1386_s16 = smov %s1051_s17  ;;  %s1387_s17 = smov %s1167_s9 }
 0x187   : > { %s1388_s18 = smov %s1147_s27  ;;  %24 = sbr.rel (!%p22_p11) target bundleno = 8 (0x8), region = 109 }
 0x18c   :  { %572 = vsyncpa [#allocation3], 1 }
 0x18d   :  { %574 = vsyncpa [#allocation3 + $0x1], 1 }
 0x18e   :  { %575 = vsyncpa [#allocation6], 1 }
 0x18f   :  { %576 = vsyncpa [#allocation4], 1 }
 0x190   :  { %578 = vsyncpa [#allocation4 + $0x1], 1 }
 0x191   :  { %579 = vsyncpa [#allocation9], 1 }
 0x192   :  { %581 = vsyncpa [#allocation9 + $0x1], 1 }

</bundles_post_ra>
